<compile_context>
chip_gen: v7x
topology: tpu7x:2x2x1
jax: 0.10.0
libtpu: 0.0.40
codegen_flags: <defaults>
</compile_context>

<pallas_src>
import functools
import jax
import jax.numpy as jnp
from jax.experimental import pallas as pl
from jax.experimental.pallas import tpu as pltpu


def _silu_f32(x):
    return x * jax.nn.sigmoid(x)


def _mlp_block_kernel(x_ref, cond_ref, w_ref, we_ref, pvec_ref, o_ref, *,
                      cond_bias, eps, c_out_real, c_out_pad):
    w = w_ref[...]
    we = we_ref[...]

    # --- Main linear.  Cast x to the MXU compute dtype in VMEM (no HBM cost),
    #     accumulate in f32 via preferred_element_type.
    x = x_ref[...]
    if x.dtype != w.dtype:
        x = x.astype(w.dtype)
    h = jnp.dot(x, w, preferred_element_type=jnp.float32)

    # --- Conditioning path: SiLU(cond) (f32 on VPU/EUP) -> linear_emb on MXU.
    c = _silu_f32(cond_ref[...].astype(jnp.float32)).astype(we.dtype)
    c = jnp.dot(c, we, preferred_element_type=jnp.float32)

    # Packed per-feature vectors: rows = [b, be, gamma, beta, lane_mask] (f32).
    pvec = pvec_ref[...]
    b, be = pvec[0:1, :], pvec[1:2, :]
    gamma, beta = pvec[2:3, :], pvec[3:4, :]

    # (x @ W + b) * (cond_bias + (silu(cond) @ We + be))  -- fused, single pass.
    h = (h + b) * (cond_bias + (c + be))

    # --- LayerNorm over the real (unpadded) feature lanes, biased variance.
    # Padded lanes of h are exactly zero (zero-padded W/We/b/be columns), so the
    # plain row-sum already equals the sum over real lanes.
    inv_c = 1.0 / float(c_out_real)
    mean = jnp.sum(h, axis=-1, keepdims=True) * inv_c
    centered = h - mean
    if c_out_pad != c_out_real:
        centered = centered * pvec[4:5, :]      # precomputed pad-lane mask row
    var = jnp.sum(centered * centered, axis=-1, keepdims=True) * inv_c
    h = centered * jax.lax.rsqrt(var + eps)
    h = h * gamma + beta

    # --- Final activation (SiLU), cast to output dtype on store.
    o_ref[...] = _silu_f32(h).astype(o_ref.dtype)


def _round_up(v, m):
    return ((v + m - 1) // m) * m


def _choose_tile_m(n, requested):
    """Pick a row tile: big enough to amortize per-step overhead, but keep
    at least 2 grid steps when possible (v7x megacore)."""
    if n <= 8:
        return max(n, 1)                       # single full-extent block
    if n >= 2 * requested:
        return requested
    # Small/medium N: split rows into two blocks so both TCs get work.
    half = _round_up(pl.cdiv(n, 2), 8)
    return min(requested, half)


def _vmem_capacity_bytes():
    try:
        cap = getattr(pltpu.get_tpu_info(), "vmem_capacity_bytes", None)
        if cap:
            return int(cap)
    except Exception:
        pass
    return 64 * 1024 * 1024                    # conservative: v7x per-TC VMEM


def _vmem_budget_bytes(tile_m, c_in, c_cond, c_out_p,
                       x_item, cond_item, w_item, out_item):
    act = 2 * tile_m * (c_in * x_item + c_cond * cond_item)   # 2-deep input bufs
    out = 2 * tile_m * c_out_p * out_item                     # 2-deep output bufs
    wts = (c_in + c_cond) * c_out_p * w_item + 5 * c_out_p * 4  # Buffered(1) residents
    tmp = 2 * tile_m * c_out_p * 4                             # f32 h / centered live values
    return act + out + wts + tmp


def mlp_block_pallas(x, cond, params, *, cond_bias=1.0, eps=1e-5, tile_m=512,
                     compute_dtype=None, out_dtype=None):
    """x: (N, C_in), cond: (N, C_cond). Returns (N, C_out)."""
    w, b, we, be, gamma, beta = params
    n, c_in = x.shape
    c_cond = cond.shape[-1]
    c_out = w.shape[1]

    compute_dtype = jnp.dtype(compute_dtype) if compute_dtype is not None else jnp.dtype(w.dtype)
    out_dtype = jnp.dtype(out_dtype) if out_dtype is not None else jnp.dtype(x.dtype)

    # Only the lane (C_out) dim of the small reused tensors is padded to 128.
    # Activations are streamed exactly as stored (no pad / cast HBM pass).
    c_out_p = _round_up(c_out, 128)
    w_p = jnp.pad(w.astype(compute_dtype), ((0, 0), (0, c_out_p - c_out)))
    we_p = jnp.pad(we.astype(compute_dtype), ((0, 0), (0, c_out_p - c_out)))

    # Pack [b, be, gamma, beta, lane_mask] into one (5, C_out_p) f32 block: a
    # single DMA, and the pad-lane mask rides along for free.
    rows = [b.reshape(1, -1), be.reshape(1, -1),
            gamma.reshape(1, -1), beta.reshape(1, -1),
            jnp.ones((1, c_out), jnp.float32)]
    pvec = jnp.concatenate([r.astype(jnp.float32) for r in rows], axis=0)
    pvec_p = jnp.pad(pvec, ((0, 0), (0, c_out_p - c_out)))

    # Shape-derived tile / VMEM budget (keeps headroom under the per-TC cap).
    x_item = jnp.dtype(x.dtype).itemsize
    cond_item = jnp.dtype(cond.dtype).itemsize
    w_item = compute_dtype.itemsize
    out_item = out_dtype.itemsize
    tile_m = _choose_tile_m(n, tile_m)
    cap = _vmem_capacity_bytes()
    headroom = 12 * 1024 * 1024
    while tile_m >= 128 and _vmem_budget_bytes(
            tile_m, c_in, c_cond, c_out_p, x_item, cond_item, w_item, out_item) > cap - headroom:
        tile_m = max(64, (tile_m // 2) // 8 * 8)
    budget = _vmem_budget_bytes(tile_m, c_in, c_cond, c_out_p,
                                x_item, cond_item, w_item, out_item)
    vmem_limit = int(min(max(budget + 8 * 1024 * 1024, 32 * 1024 * 1024),
                         cap - 2 * 1024 * 1024))

    kernel = functools.partial(
        _mlp_block_kernel, cond_bias=float(cond_bias), eps=float(eps),
        c_out_real=int(c_out), c_out_pad=int(c_out_p))

    grid = (pl.cdiv(n, tile_m),)
    resident = pl.Buffered(1)   # constant-index blocks: no double buffer

    cost = pl.CostEstimate(
        flops=2 * n * c_out * (c_in + c_cond),
        transcendentals=n * (c_cond + 2 * c_out),
        bytes_accessed=(n * c_in * x_item + n * c_cond * cond_item
                        + (c_in + c_cond) * c_out_p * w_item + 5 * c_out_p * 4
                        + n * c_out_p * out_item))

    out = pl.pallas_call(
        kernel,
        out_shape=jax.ShapeDtypeStruct((n, c_out_p), out_dtype),
        grid_spec=pltpu.PrefetchScalarGridSpec(
            num_scalar_prefetch=0,
            grid=grid,
            in_specs=[
                # Activations: last dim = full array dim (legal even if <128);
                # ragged last row block handled by Pallas partial-block writes.
                pl.BlockSpec((tile_m, c_in), lambda i: (i, 0)),
                pl.BlockSpec((tile_m, c_cond), lambda i: (i, 0)),
                # Constant-index, VMEM-resident, single-buffered.
                pl.BlockSpec((c_in, c_out_p), lambda i: (0, 0), pipeline_mode=resident),
                pl.BlockSpec((c_cond, c_out_p), lambda i: (0, 0), pipeline_mode=resident),
                pl.BlockSpec((5, c_out_p), lambda i: (0, 0), pipeline_mode=resident),
            ],
            out_specs=pl.BlockSpec((tile_m, c_out_p), lambda i: (i, 0)),
        ),
        compiler_params=pltpu.CompilerParams(
            dimension_semantics=("parallel",),
            vmem_limit_bytes=vmem_limit),
        cost_estimate=cost,
    )(x, cond, w_p, we_p, pvec_p)

    if c_out_p != c_out:
        out = out[:, :c_out]
    return out


def make_params(key, c_in, c_out, c_cond, dtype=jnp.float32):
    """Deterministic synthetic parameters (same shapes as the PyTorch module)."""
    k1, k2, k3, k4 = jax.random.split(key, 4)
    # nn.Linear(C_in, C_out): weight (C_out, C_in), bias (C_out) -> pass W^T
    w = jax.random.normal(k1, (c_in, c_out), dtype) * (1.0 / jnp.sqrt(c_in))
    b = jax.random.normal(k2, (1, c_out), dtype) * 0.01
    # nn.Linear(C_cond, C_out)
    we = jax.random.normal(k3, (c_cond, c_out), dtype) * (1.0 / jnp.sqrt(c_cond))
    be = jax.random.normal(k4, (1, c_out), dtype) * 0.01
    # LayerNorm affine init: weight=1, bias=0
    gamma = jnp.ones((1, c_out), dtype)
    beta = jnp.zeros((1, c_out), dtype)
    return (w, b, we, be, gamma, beta)


def mlp_block_ref(x, cond, params, cond_bias=1.0, eps=1e-5):
    w, b, we, be, gamma, beta = params
    h = x @ w + b
    c = _silu_f32(cond) @ we + be
    h = h * (cond_bias + c)
    mean = jnp.mean(h, axis=-1, keepdims=True)
    var = jnp.mean((h - mean) ** 2, axis=-1, keepdims=True)
    h = (h - mean) / jnp.sqrt(var + eps) * gamma + beta
    return _silu_f32(h)


if __name__ == "__main__":
    B, S = 2, 8            # batch, seq -> N = 16 rows (grid of 2 row blocks)
    C_IN, C_OUT, C_COND = 32, 64, 16
    COND_BIAS = 1.0

    key = jax.random.PRNGKey(0)
    kx, kc, kp = jax.random.split(key, 3)
    x = jax.random.normal(kx, (B, S, C_IN), jnp.float32)
    cond = jax.random.normal(kc, (B, S, C_COND), jnp.float32)
    params = make_params(kp, C_IN, C_OUT, C_COND)

    x2 = x.reshape(B * S, C_IN)
    cond2 = cond.reshape(B * S, C_COND)
    ref = mlp_block_ref(x2, cond2, params, cond_bias=COND_BIAS)

    # f32 path (tight correctness check).
    out_f32 = mlp_block_pallas(x2, cond2, params, cond_bias=COND_BIAS)
    jax.block_until_ready(out_f32)
    assert jnp.allclose(out_f32, ref, atol=2e-5, rtol=2e-5), "f32 mismatch vs reference"

    # bf16 compute path (halves activation HBM traffic, full-rate MXU) — loose
    # tolerance: numeric drift from bf16 quantization, not a bug.
    out_bf16 = mlp_block_pallas(
        x2.astype(jnp.bfloat16), cond2.astype(jnp.bfloat16), params,
        cond_bias=COND_BIAS, compute_dtype=jnp.bfloat16, out_dtype=jnp.float32)
    jax.block_until_ready(out_bf16)
    assert jnp.allclose(out_bf16, ref, atol=1e-1, rtol=1e-1), "bf16 mismatch vs reference"

    out = out_f32.reshape(B, S, C_OUT)
    jax.block_until_ready(out)
    print("KERNEL_OK")
</pallas_src>

<mosaic_0001>
module attributes {stable_mosaic.version = 11 : i64} {
  func.func @_mlp_block_kernel(%arg0: i32, %arg1: memref<8x32xf32, #tpu.memory_space<vmem>>, %arg2: memref<8x16xf32, #tpu.memory_space<vmem>>, %arg3: memref<32x128xf32, #tpu.memory_space<vmem>>, %arg4: memref<16x128xf32, #tpu.memory_space<vmem>>, %arg5: memref<5x128xf32, #tpu.memory_space<vmem>>, %arg6: memref<8x128xf32, #tpu.memory_space<vmem>>) attributes {dimension_semantics = [#tpu.dimension_semantics<parallel>], iteration_bounds = array<i64: 2>, scalar_prefetch = 0 : i64, scratch_operands = 0 : i64, tpu.core_type = #tpu.core_type<tc>, window_params = [{transform_indices = @transform_0, window_bounds = array<i64: 8, 32>}, {transform_indices = @transform_1, window_bounds = array<i64: 8, 16>}, {pipeline_mode = #tpu.pipeline_mode<synchronous>, transform_indices = @transform_2, window_bounds = array<i64: 32, 128>}, {pipeline_mode = #tpu.pipeline_mode<synchronous>, transform_indices = @transform_3, window_bounds = array<i64: 16, 128>}, {pipeline_mode = #tpu.pipeline_mode<synchronous>, transform_indices = @transform_4, window_bounds = array<i64: 5, 128>}, {transform_indices = @transform_5, window_bounds = array<i64: 8, 128>}]} {
    %c0 = arith.constant 0 : index
    %c0_0 = arith.constant 0 : index
    %0 = vector.load %arg3[%c0, %c0_0] : memref<32x128xf32, #tpu.memory_space<vmem>>, vector<32x128xf32>
    %c0_1 = arith.constant 0 : index
    %c0_2 = arith.constant 0 : index
    %1 = vector.load %arg4[%c0_1, %c0_2] : memref<16x128xf32, #tpu.memory_space<vmem>>, vector<16x128xf32>
    %c0_3 = arith.constant 0 : index
    %c0_4 = arith.constant 0 : index
    %2 = vector.load %arg1[%c0_3, %c0_4] : memref<8x32xf32, #tpu.memory_space<vmem>>, vector<8x32xf32>
    %cst = arith.constant dense<0.000000e+00> : vector<8x128xf32>
    %3 = tpu.matmul %2, %0, %cst {dimension_numbers = #tpu.dot_dimension_numbers<[1], [0], [0], [1], [0, 0, 1, 1], [], []>} : vector<8x32xf32>, vector<32x128xf32>, vector<8x128xf32> -> vector<8x128xf32>
    %c0_5 = arith.constant 0 : index
    %c0_6 = arith.constant 0 : index
    %4 = vector.load %arg2[%c0_5, %c0_6] : memref<8x16xf32, #tpu.memory_space<vmem>>, vector<8x16xf32>
    %5 = arith.negf %4 : vector<8x16xf32>
    %6 = math.exp %5 : vector<8x16xf32>
    %cst_7 = arith.constant 1.000000e+00 : f32
    %7 = vector.broadcast %cst_7 : f32 to vector<8x16xf32>
    %8 = arith.addf %7, %6 : vector<8x16xf32>
    %9 = arith.divf %7, %8 : vector<8x16xf32>
    %10 = arith.mulf %4, %9 : vector<8x16xf32>
    %cst_8 = arith.constant dense<0.000000e+00> : vector<8x128xf32>
    %11 = tpu.matmul %10, %1, %cst_8 {dimension_numbers = #tpu.dot_dimension_numbers<[1], [0], [0], [1], [0, 0, 1, 1], [], []>} : vector<8x16xf32>, vector<16x128xf32>, vector<8x128xf32> -> vector<8x128xf32>
    %c0_9 = arith.constant 0 : index
    %c0_10 = arith.constant 0 : index
    %12 = vector.load %arg5[%c0_9, %c0_10] : memref<5x128xf32, #tpu.memory_space<vmem>>, vector<5x128xf32>
    %13 = vector.extract_strided_slice %12 {offsets = [0, 0], sizes = [1, 128], strides = [1, 1]} : vector<5x128xf32> to vector<1x128xf32>
    %14 = vector.extract_strided_slice %12 {offsets = [1, 0], sizes = [1, 128], strides = [1, 1]} : vector<5x128xf32> to vector<1x128xf32>
    %15 = vector.extract_strided_slice %12 {offsets = [2, 0], sizes = [1, 128], strides = [1, 1]} : vector<5x128xf32> to vector<1x128xf32>
    %16 = vector.extract_strided_slice %12 {offsets = [3, 0], sizes = [1, 128], strides = [1, 1]} : vector<5x128xf32> to vector<1x128xf32>
    %17 = vector.broadcast %13 : vector<1x128xf32> to vector<8x128xf32>
    %18 = arith.addf %3, %17 : vector<8x128xf32>
    %19 = vector.broadcast %14 : vector<1x128xf32> to vector<8x128xf32>
    %20 = arith.addf %11, %19 : vector<8x128xf32>
    %cst_11 = arith.constant 1.000000e+00 : f32
    %21 = vector.broadcast %cst_11 : f32 to vector<8x128xf32>
    %22 = arith.addf %21, %20 : vector<8x128xf32>
    %23 = arith.mulf %18, %22 : vector<8x128xf32>
    %cst_12 = arith.constant dense<0.000000e+00> : vector<8xf32>
    %24 = vector.multi_reduction <add>, %23, %cst_12 [1] : vector<8x128xf32> to vector<8xf32>
    %25 = vector.shape_cast %24 : vector<8xf32> to vector<8x1xf32>
    %cst_13 = arith.constant 1.562500e-02 : f32
    %26 = vector.broadcast %cst_13 : f32 to vector<8x1xf32>
    %27 = arith.mulf %25, %26 : vector<8x1xf32>
    %28 = vector.broadcast %27 : vector<8x1xf32> to vector<8x128xf32>
    %29 = arith.subf %23, %28 : vector<8x128xf32>
    %30 = vector.extract_strided_slice %12 {offsets = [4, 0], sizes = [1, 128], strides = [1, 1]} : vector<5x128xf32> to vector<1x128xf32>
    %31 = vector.broadcast %30 : vector<1x128xf32> to vector<8x128xf32>
    %32 = arith.mulf %29, %31 : vector<8x128xf32>
    %33 = arith.mulf %32, %32 : vector<8x128xf32>
    %cst_14 = arith.constant dense<0.000000e+00> : vector<8xf32>
    %34 = vector.multi_reduction <add>, %33, %cst_14 [1] : vector<8x128xf32> to vector<8xf32>
    %35 = vector.shape_cast %34 : vector<8xf32> to vector<8x1xf32>
    %cst_15 = arith.constant 1.562500e-02 : f32
    %36 = vector.broadcast %cst_15 : f32 to vector<8x1xf32>
    %37 = arith.mulf %35, %36 : vector<8x1xf32>
    %cst_16 = arith.constant 9.99999974E-6 : f32
    %38 = vector.broadcast %cst_16 : f32 to vector<8x1xf32>
    %39 = arith.addf %37, %38 : vector<8x1xf32>
    %40 = math.rsqrt %39 : vector<8x1xf32>
    %41 = vector.broadcast %40 : vector<8x1xf32> to vector<8x128xf32>
    %42 = arith.mulf %32, %41 : vector<8x128xf32>
    %43 = vector.broadcast %15 : vector<1x128xf32> to vector<8x128xf32>
    %44 = arith.mulf %42, %43 : vector<8x128xf32>
    %45 = vector.broadcast %16 : vector<1x128xf32> to vector<8x128xf32>
    %46 = arith.addf %44, %45 : vector<8x128xf32>
    %47 = arith.negf %46 : vector<8x128xf32>
    %48 = math.exp %47 : vector<8x128xf32>
    %cst_17 = arith.constant 1.000000e+00 : f32
    %49 = vector.broadcast %cst_17 : f32 to vector<8x128xf32>
    %50 = arith.addf %49, %48 : vector<8x128xf32>
    %51 = arith.divf %49, %50 : vector<8x128xf32>
    %52 = arith.mulf %46, %51 : vector<8x128xf32>
    %c0_18 = arith.constant 0 : index
    %c0_19 = arith.constant 0 : index
    %53 = vector.load %arg6[%c0_18, %c0_19] : memref<8x128xf32, #tpu.memory_space<vmem>>, vector<8x128xf32>
    tpu.vector_store %arg6[%c0_18, %c0_19], %52 {strides = array<i32>} : memref<8x128xf32, #tpu.memory_space<vmem>>, vector<8x128xf32>,
    return
  }
  func.func @transform_0(%arg0: i32) -> (i32, i32) {
    %c0_i32 = arith.constant 0 : i32
    %c0_i32_0 = arith.constant 0 : i32
    return %arg0, %c0_i32 : i32, i32
  }
  func.func @transform_1(%arg0: i32) -> (i32, i32) {
    %c0_i32 = arith.constant 0 : i32
    %c0_i32_0 = arith.constant 0 : i32
    return %arg0, %c0_i32 : i32, i32
  }
  func.func @transform_2(%arg0: i32) -> (i32, i32) {
    %c0_i32 = arith.constant 0 : i32
    %c0_i32_0 = arith.constant 0 : i32
    %c0_i32_1 = arith.constant 0 : i32
    return %c0_i32, %c0_i32_0 : i32, i32
  }
  func.func @transform_3(%arg0: i32) -> (i32, i32) {
    %c0_i32 = arith.constant 0 : i32
    %c0_i32_0 = arith.constant 0 : i32
    %c0_i32_1 = arith.constant 0 : i32
    return %c0_i32, %c0_i32_0 : i32, i32
  }
  func.func @transform_4(%arg0: i32) -> (i32, i32) {
    %c0_i32 = arith.constant 0 : i32
    %c0_i32_0 = arith.constant 0 : i32
    %c0_i32_1 = arith.constant 0 : i32
    return %c0_i32, %c0_i32_0 : i32, i32
  }
  func.func @transform_5(%arg0: i32) -> (i32, i32) {
    %c0_i32 = arith.constant 0 : i32
    %c0_i32_0 = arith.constant 0 : i32
    return %arg0, %c0_i32 : i32, i32
  }
}

</mosaic_0001>

<bundles_post_ra>
// kernel: tpu_custom_call.1
= control target key start
LH: loop header
LB: loop body
LE: loop exit
PB: predicated region body
PF: predicated region fallthrough
CT: control target
= control target key end

     0   :  { %s1300_s0 = inlined_call_operand.hbm [shape: f32[16,32], index: 0, kind: input, shape index: {}]   ;;  %s1301_s1 = inlined_call_operand.hbm [shape: f32[16,16], index: 1, kind: input, shape index: {}]   ;;  %s1302_s2 = inlined_call_operand.hbm [shape: f32[32,128], index: 2, kind: input, shape index: {}]   ;;  %s1303_s3 = inlined_call_operand.hbm [shape: f32[16,128], index: 3, kind: input, shape index: {}]   ;;  %s1304_s4 = inlined_call_operand.vmem [shape: f32[5,128], index: 4, kind: input, shape index: {}]   ;;  %s1305_s5 = inlined_call_operand.hbm [shape: f32[16,128], index: 5, kind: output, shape index: {}]  }
   0x1   :  { %1310 = sst [smem:[#allocation16_spill]] %s1302_s2 }
   0x2   :  { %1311 = sst [smem:[#allocation17_spill]] %s1303_s3 }
   0x3   :  { %10 = vsyncpa [#allocation3], 0 }
   0x4   :  { %12 = vsyncpa [#allocation3 + $0x1], 0 }
   0x5   :  { %13 = vsyncpa [#allocation6], 0 }
   0x6   :  { %15 = vsyncpa [#allocation6 + $0x1], 0 }
   0x7   :  { %16 = vsyncpa [#allocation9], 0 }
   0x8   :  { %17 = vsyncpa [#allocation4], 0 }
   0x9   :  { %19 = vsyncpa [#allocation4 + $0x1], 0  ;;  %s1021_s18 = smov 0   ;;  %s1023_s19 = smov 0  }
   0xa   :  { %s1025_s20 = smov 0   ;;  %s1027_s21 = smov 0  }
   0xb LB: > { %s1042_s22 = sadd.s32 4294967295, %s979_s21   ;;  %s640_s23 = sadd.s32 4294967294, %s979_s21   ;;  %s979_s21 = sphi %s1027_s21, %s1333_s21   ;;  %s975_s20 = sphi %s1025_s20, %s1332_s20   ;;  %s971_s19 = sphi %s1023_s19, %s1331_s19   ;;  %s967_s18 = sphi %s1021_s18, %s1330_s18  }
   0xc   : > { %p45_p0 = scmp.ne.s32.totalorder %s971_s19, %s967_s18  ;;  %p1306_p1 = scmp.eq.s32.totalorder %s1042_s22, 0 }
   0xd   : > { %p164_p3 = scmp.eq.s32.totalorder %s640_s23, 1  ;;  %p641_p5 = scmp.ge.s32.totalorder %s979_s21, 1 }
   0xe   : > { %p1051_p4 = por %p1306_p1, %p45_p0  ;;  %p171_p7 = scmp.lt.s32.totalorder %s979_s21, 3 }
   0xf   : > { %p1056_p6 = por %p164_p3, %p45_p0  ;;  %s981_s27 = smov [#allocation7]  }
  0x10   : > { %s1312_s24 = scalar_select %p1051_p4, 1, 0 }
  0x11   : > { %s1313_s25 = scalar_select %p1056_p6, 1, 0 }
  0x12   : > { %p1061_p8 = pnand %p641_p5, %p171_p7  ;;  %s183_s28 = sshll.u32 %s981_s27, 4  ;;  %s1065_s28 = int_to_ptr.vmem [resolvable:$true] %s183_s28 }
  0x13   : > { %s982_s30 = smov [#allocation8]   ;;  %s1316_s2 = sld [smem:[#allocation16_spill]] }
  0x14   : > { %s1314_s26 = scalar_select %p1061_p8, 1, 0 }
  0x15   : > { %p712_p9 = pneg %p1061_p8  ;;  %s196_s6 = sshll.u32 %s982_s30, 4  ;;  %s1076_s6 = int_to_ptr.vmem [resolvable:$true] %s196_s6 }
  0x17   : > { %p1072_p11 = pnand %p712_p9, %p1306_p1 }
  0x19   : > { %s785_s9 = scalar_lea.hbm %s1316_s2, 512  ;;  %p787_p13 = pneg %p1072_p11 }
  0x1a   : > { %p786_p12 = scmp.ne.s32.totalorder %s1316_s2, %s785_s9  ;;  %p792_p5 = scmp.lt.u32.totalorder %s785_s9, %s1316_s2 }
  0x1c   : > { %p788_p0 = pnand %p787_p13, %p786_p12 }
  0x1e   : > { %p789_p3 = pneg %p788_p0 }
  0x20   : > { %p794_p7 = pnand %p792_p5, %p789_p3 }
  0x22   : > { %797 = shalt.err (!%p794_p7)
}
  0x23   : > { %s798_s14 = scalar_lea.vmem %s1065_s28, 512  ;;  %p806_p2 = scmp.lt.s32.totalorder %s1065_s28, %s1065_s28 }
  0x24   : > { %p799_p9 = scmp.ne.s32.totalorder %s1065_s28, %s798_s14  ;;  %p807_p12 = scmp.lt.s32.totalorder %s798_s14, %s798_s14 }
  0x26   : > { %p801_p10 = pnand %p799_p9, %p787_p13  ;;  %p808_p0 = por %p807_p12, %p806_p2 }
  0x28   : > { %p802_p1 = pneg %p801_p10 }
  0x2a   : > { %p809_p6 = pnand %p808_p0, %p802_p1 }
  0x2c   : > { %812 = shalt.err (!%p809_p6)
}
  0x2d   : > { %s983_s15 = smov 128   ;;  %s984_s16 = smov 8  }
  0x2e   : > { %715 = dma.hbm_to_vmem [thread:$0]  (!%p1072_p11), %s1316_s2, 512, %s1065_s28, [#allocation6], %s983_s15, %s983_s15, %s984_s16  }
  0x2f   : > { %s1317_s3 = sld [smem:[#allocation17_spill]] }
  0x35   : > { %s813_s7 = scalar_lea.hbm %s1317_s3, 256 }
  0x36   : > { %p814_p2 = scmp.ne.s32.totalorder %s1317_s3, %s813_s7  ;;  %p820_p10 = scmp.lt.u32.totalorder %s813_s7, %s1317_s3 }
  0x38   : > { %p816_p1 = pnand %p814_p2, %p787_p13 }
  0x3a   : > { %p817_p6 = pneg %p816_p1 }
  0x3c   : > { %p822_p3 = pnand %p820_p10, %p817_p6 }
  0x3e   : > { %825 = shalt.err (!%p822_p3)
}
  0x3f   : > { %s826_s28 = scalar_lea.vmem %s1076_s6, 256  ;;  %p834_p12 = scmp.lt.s32.totalorder %s1076_s6, %s1076_s6 }
  0x40   : > { %p827_p5 = scmp.ne.s32.totalorder %s1076_s6, %s826_s28  ;;  %p835_p0 = scmp.lt.s32.totalorder %s826_s28, %s826_s28 }
  0x42   : > { %p829_p7 = pnand %p827_p5, %p787_p13  ;;  %p836_p2 = por %p835_p0, %p834_p12 }
  0x44   : > { %p830_p9 = pneg %p829_p7 }
  0x46   : > { %p837_p1 = pnand %p836_p2, %p830_p9 }
  0x48   : > { %840 = shalt.err (!%p837_p1)
}
  0x49   : > { %718 = dma.hbm_to_vmem [thread:$0]  (!%p1072_p11), %s1317_s3, 256, %s1076_s6, [#allocation9], %s983_s15, %s983_s15, %s984_s16  }
  0x4a   : > { %s1131_s14 = sadd.s32 1, %s979_s21   ;;  %s32_s29 = sadd.s32 1, %s975_s20 }
  0x4b   : > { %s29_s17 = ssub.s32 %s979_s21, %s1131_s14  ;;  %p39_p13 = scmp.ne.s32.totalorder %s975_s20, %s971_s19 }
  0x4c   : > { %p30_p6 = scmp.eq.s32.totalorder %s29_s17, 0  ;;  %p40_p10 = scmp.eq.s32.totalorder %s979_s21, 0 }
  0x4d   : > { %p1318_p3 = scmp.eq.s32.totalorder %s1042_s22, 1  ;;  %p732_p7 = scmp.lt.s32.totalorder %s979_s21, 2 }
  0x4e   : > { %s1147_s27 = scalar_select %p30_p6, %s975_s20, %s32_s29  }
  0x4f   : > { %p1141_p5 = por %p1318_p3, %p39_p13  ;;  %p41_p9 = por %p40_p10, %p39_p13 }
  0x50   : > { %s213_s30 = sand.u32 1, %s975_s20   ;;  %s646_s15 = sshll.u32 %s979_s21, 7 }
  0x51   : > { %s1319_s23 = scalar_select %p1141_p5, 1, 0 }
  0x52   : > { %s1150_s6 = sshll.u32 %s213_s30, 3  ;;  %s1156_s8 = scalar_lea.hbm %s1300_s0, %s646_s15 }
  0x53   : > { %s217_s9 = scalar_lea.vmem [#allocation2], %s1150_s6  ;;  %p1161_p11 = pnand %p732_p7, %p41_p9 }
  0x54   : > { %s224_s10 = sshll.u32 %s217_s9, 4  ;;  %s1168_s13 = scalar_lea.hbm %s1301_s1, %s646_s15  ;;  %s1159_s10 = int_to_ptr.vmem [resolvable:$true] %s224_s10 }
  0x55   : > { %s231_s29 = sand.u32 1, %s979_s21   ;;  %s214_s17 = scalar_lea.sflag [#allocation3], %s213_s30 }
  0x56   : > { %s841_s16 = scalar_lea.hbm %s1156_s8, 128  ;;  %p843_p0 = pneg %p1161_p11 }
  0x57   : > { %p842_p12 = scmp.ne.s32.totalorder %s1156_s8, %s841_s16  ;;  %s846_s2 = scalar_lea.hbm %s1300_s0, 256 }
  0x58   : > { %p847_p13 = scmp.lt.u32.totalorder %s1156_s8, %s1300_s0  ;;  %p848_p6 = scmp.lt.u32.totalorder %s846_s2, %s841_s16 }
  0x59   : > { %p844_p2 = pnand %p843_p0, %p842_p12  ;;  %p850_p3 = scmp.lt.u32.totalorder %s841_s16, %s1156_s8 }
  0x5a   : > { %p849_p10 = por %p848_p6, %p847_p13 }
  0x5b   : > { %p845_p1 = pneg %p844_p2 }
  0x5c   : > { %p851_p7 = por %p850_p3, %p849_p10 }
  0x5e   : > { %p852_p9 = pnand %p851_p7, %p845_p1 }
  0x60   : > { %855 = shalt.err (!%p852_p9)
}
  0x61   : > { %s856_s30 = scalar_lea.vmem %s1159_s10, 128  ;;  %s985_s15 = smov [#allocation2]  }
  0x62   : > { %p857_p12 = scmp.ne.s32.totalorder %s1159_s10, %s856_s30  ;;  %s861_s12 = sshll.u32 %s985_s15, 4  ;;  %s862_s12 = int_to_ptr.vmem [resolvable:$false] %s861_s12 }
  0x63   : > { %s863_s3 = scalar_lea.vmem %s862_s12, 256  ;;  %p864_p4 = scmp.lt.s32.totalorder %s1159_s10, %s862_s12 }
  0x64   : > { %p859_p2 = pnand %p857_p12, %p843_p0  ;;  %p865_p13 = scmp.lt.s32.totalorder %s863_s3, %s856_s30 }
  0x66   : > { %p860_p5 = pneg %p859_p2  ;;  %p866_p6 = por %p865_p13, %p864_p4 }
  0x68   : > { %p867_p10 = pnand %p866_p6, %p860_p5 }
  0x6a   : > { %870 = shalt.err (!%p867_p10)
}
  0x6b   : > { %722 = dma.hbm_to_vmem [thread:$0]  (!%p1161_p11), %s1156_s8, 128, %s1159_s10, %s214_s17  }
  0x6c   : > { %s235_s2 = scalar_lea.vmem [#allocation5], %s1150_s6  ;;  %s232_s7 = scalar_lea.sflag [#allocation6], %s231_s29 }
  0x6d   : > { %s242_s16 = sshll.u32 %s235_s2, 4  ;;  %s871_s9 = scalar_lea.hbm %s1168_s13, 128  ;;  %s243_s16 = int_to_ptr.vmem [resolvable:$true] %s242_s16 }
  0x6e   : > { %p872_p4 = scmp.ne.s32.totalorder %s1168_s13, %s871_s9  ;;  %s876_s15 = scalar_lea.hbm %s1301_s1, 256 }
  0x6f   : > { %p877_p3 = scmp.lt.u32.totalorder %s1168_s13, %s1301_s1  ;;  %p878_p7 = scmp.lt.u32.totalorder %s876_s15, %s871_s9 }
  0x70   : > { %p874_p5 = pnand %p872_p4, %p843_p0  ;;  %p880_p12 = scmp.lt.u32.totalorder %s871_s9, %s1168_s13 }
  0x71   : > { %p879_p9 = por %p878_p7, %p877_p3 }
  0x72   : > { %p875_p1 = pneg %p874_p5 }
  0x73   : > { %p881_p2 = por %p880_p12, %p879_p9 }
  0x75   : > { %p882_p13 = pnand %p881_p2, %p875_p1 }
  0x77   : > { %885 = shalt.err (!%p882_p13)
}
  0x78   : > { %s886_s6 = scalar_lea.vmem %s243_s16, 128  ;;  %s986_s8 = smov [#allocation5]  }
  0x79   : > { %p887_p6 = scmp.ne.s32.totalorder %s243_s16, %s886_s6  ;;  %s891_s10 = sshll.u32 %s986_s8, 4  ;;  %s892_s10 = int_to_ptr.vmem [resolvable:$false] %s891_s10 }
  0x7a   : > { %s893_s29 = scalar_lea.vmem %s892_s10, 256  ;;  %p894_p5 = scmp.lt.s32.totalorder %s243_s16, %s892_s10 }
  0x7b   : > { %p889_p10 = pnand %p887_p6, %p843_p0  ;;  %p895_p8 = scmp.lt.s32.totalorder %s893_s29, %s886_s6 }
  0x7d   : > { %p890_p4 = pneg %p889_p10  ;;  %p896_p3 = por %p895_p8, %p894_p5 }
  0x7f   : > { %p897_p7 = pnand %p896_p3, %p890_p4 }
  0x81   : > { %900 = shalt.err (!%p897_p7)
}
  0x82   : > { %725 = dma.hbm_to_vmem [thread:$0]  (!%p1161_p11), %s1168_s13, 128, %s243_s16, %s232_s7  }
  0x83   : > { %p1321_p1 = scmp.ne.s32.totalorder %s1314_s26, 0 }
  0x84   : > { %s1221_s17 = sand.u32 (!%p1321_p1), 1, %s971_s19   ;;  %p1322_p8 = scmp.ne.s32.totalorder (!%p1321_p1), %s1312_s24, 0 }
  0x85   : > { %251 = sbr.rel (%p1321_p1) target bundleno = 756 (0x2f4), region = 40  ;;  %s1224_s2 = sshll.u32 (!%p1321_p1), %s1221_s17, 3 }
  0x86   : > { %s254_s9 = scalar_lea.sflag (!%p1321_p1), [#allocation3], %s1221_s17  ;;  %s257_s28 = scalar_lea.vmem (!%p1321_p1), [#allocation2], %s1224_s2 }
  0x8c   : > { %946 = dma.done.wait (%p1322_p8), %s254_s9, 128  }
  0x8d   : > { %948 = vsyncadd (%p1322_p8), %s254_s9, 4294967168  ;;  %s262_s26 = sand.u32 1, %s1042_s22   ;;  %s266_s13 = scalar_lea.vmem [#allocation5], %s1224_s2 }
  0x8e   : > { %s263_s11 = scalar_lea.sflag [#allocation6], %s262_s26 }
  0x8f   : > { %950 = dma.done.wait (%p1322_p8), %s263_s11, 128  }
  0x90   : > { %952 = vsyncadd (%p1322_p8), %s263_s11, 4294967168  ;;  %p1323_p11 = scmp.eq.s32.totalorder %s1042_s22, 0 }
  0x92   : > { %954 = dma.done.wait (%p1323_p11), [#allocation6], 512   ;;  %p1324_p0 = pmov %p1323_p11 }
  0x94   : > { %956 = vsyncadd (%p1324_p0), [#allocation6], 4294966784  ;;  %p1325_p9 = pmov %p1324_p0 }
  0x95   : > { %p1326_p12 = pmov %p1324_p0 }
  0x96   : > { %958 = dma.done.wait (%p1325_p9), [#allocation9], 256  }
  0x97   : > { %960 = vsyncadd (%p1326_p12), [#allocation9], 4294967040  ;;  %v987_v0 = vmov 0.0|0.0   ;;  %vm988_vm0 = vmmov 0   ;;  %v989_v1 = vmov 0.0   ;;  %v306_v2 = vld [vmem:[#allocation7] sm:$0xff]  ;;  %v322_v20 = vlaneseq }
  0x98   : > { %689 = vmatprep.subr.bf16.mxu0 %v987_v0  ;;  %695 = vmatprep.subr.bf16.mxu1 %v987_v0  ;;  %v307_v3 = vld [vmem:[#allocation7 + $0x8] sm:$0xff]  ;;  %v310_v4 = vld [vmem:[#allocation8] sm:$0xff]  ;;  %v308_v7 = vld [vmem:[#allocation7 + $0x10] sm:$0xff]  ;;  %vm326_vm1 = vcmask 261120   ;;  %vm404_vm2 = vcmask 130048   ;;  %s660_s7 = sshll.u32 %s1042_s22, 7 }
  0x99   : > { %686 = vmatprep.mubr.msk.f32.mxu1 %vm988_vm0, %v989_v1  ;;  %679 = vmatprep.mubr.msk.f32.mxu0 %vm988_vm0, %v989_v1  ;;  %v690_v5 = vpack.c.bf16 %v307_v3, %v306_v2  ;;  %v311_v6 = vld [vmem:[#allocation8 + $0x8] sm:$0xff]  ;;  %v309_v8 = vld [vmem:[#allocation7 + $0x18] sm:$0xff]  ;;  %v323_v21 = vshrl.u32 %v322_v20, 7  ;;  %v321_v24 = vld [vmem:[%s1304_s4] sm:$0x1f]  ;;  %s305_s30 = scalar_lea.vmem [#allocation10], %s1224_s2  ;;  %s1256_s6 = scalar_lea.hbm %s1305_s5, %s660_s7 }
  0x9a   : > { %v696_v9 = vpack.c.bf16 %v311_v6, %v310_v4  ;;  %v313_v10 = vld [vmem:[%s266_s13] sm:$0xff]  ;;  %v693_v11 = vpack.c.bf16 %v309_v8, %v308_v7  ;;  %v312_v13 = vld [vmem:[%s257_s28] sm:$0xff]  ;;  %s528_s15 = sshll.u32 %s305_s30, 4  ;;  %s515_s8 = scalar_lea.sflag [#allocation4], %s1221_s17  ;;  %s1258_s15 = int_to_ptr.vmem [resolvable:$true] %s528_s15 }
  0x9b   : > { %691 = vmatpush3.bf16.msra.mxu0 %v690_v5  ;;  %v655_v12 = vmul.f32 -1.442695, %v313_v10  ;;  %v402_v22 = vsub.s32 1, %v323_v21  ;;  %v324_v23 = vsub.s32 0, %v323_v21  ;;  %v486_v33 = vsub.s32 4, %v323_v21  ;;  %s901_s10 = scalar_lea.vmem %s1258_s15, 128 }
  0x9c   : > { %692 = vmatprep.subr.bf16.mxu0 %v987_v0  ;;  %697 = vmatpush3.bf16.msra.mxu1 %v696_v9  ;;  %v498_v43 = vsub.s32 2, %v323_v21  ;;  %v503_v44 = vsub.s32 3, %v323_v21  ;;  %p902_p2 = scmp.ne.s32.totalorder %s1258_s15, %s901_s10  ;;  %p1327_p13 = scmp.ne.s32.totalorder %s1319_s23, 0 }
  0x9d   : > { %775 = vpow2.f32 %v655_v12  ;;  %v403_v25 = vrot.slane %v321_v24, %v402_v22  ;;  %v325_v26 = vrot.slane %v321_v24, %v324_v23  ;;  %v487_v36 = vrot.slane %v321_v24, %v486_v33  ;;  %s990_s22 = smov [#allocation10]  }
  0x9e   : > { %v499_v45 = vrot.slane %v321_v24, %v498_v43  ;;  %v504_v48 = vrot.slane %v321_v24, %v503_v44  ;;  %p903_p6 = pnand %p902_p2, %p1327_p13  ;;  %s905_s29 = sshll.u32 %s990_s22, 4  ;;  %s906_s29 = int_to_ptr.vmem [resolvable:$false] %s905_s29 }
  0x9f   : > { %694 = vmatpush3.bf16.msra.mxu0 %v693_v11  ;;  %s907_s2 = scalar_lea.vmem %s906_s29, 256  ;;  %p908_p4 = scmp.lt.s32.totalorder %s1258_s15, %s906_s29 }
  0xa0   : > { %p904_p10 = pneg %p903_p6  ;;  %p909_p5 = scmp.lt.s32.totalorder %s907_s2, %s901_s10 }
  0xa2   : > { %680 = vmatmul.mubr.msk.f32.vlgmr.msra.gmra.mrb[0].mxu0 %vm326_vm1, %v312_v13  ;;  %p910_p3 = por %p909_p5, %p908_p4 }
  0xa4   : > { %p911_p7 = pnand %p910_p3, %p904_p10 }
  0xa7   : > { %v776_v14 = vpop.eup %775 }
  0xa8   : > { %v317_v15 = vadd.f32 1.0, %v776_v14 }
  0xaa   : > { %777 = vrcp.f32 %v317_v15 }
  0xb4   : > { %v778_v16 = vpop.eup %777 }
  0xb5   : > { %v320_v17 = vmul.f32 %v778_v16, %v313_v10 }
  0xb7   : > { %687 = vmatmul.mubr.msk.f32.vlgmr.msra.gmra.mrb[0].mxu1 %vm404_vm2, %v320_v17 }
 0x175   : > { %v396_v18 = vpop.f32.mrb[0].mxu0 }
 0x176   : > { %v681_v19 = vpop.f32.mrb[1].mxu0  ;;  %v397_v29 = vadd.f32 %v396_v18, %v325_v26 }
 0x18a   : > { %v474_v27 = vpop.f32.mrb[0].mxu1 }
 0x18b   : > { %v475_v28 = vadd.f32 %v474_v27, %v403_v25  ;;  %v688_v30 = vpop.f32.mrb[1].mxu1 }
 0x18d   : > { %v478_v31 = vadd.f32 1.0, %v475_v28 }
 0x18f   : > { %v479_v32 = vmul.f32 %v478_v31, %v397_v29 }
 0x191   : > { %480 = vadd.xlane.f32.xlu0 %v479_v32 }
 0x21e   : > { %v481_v34 = vpop.xlane.xlu0 %480 }
 0x21f   : > { %v482_v35 = vmul.f32 0.015625, %v481_v34 }
 0x221   : > { %v483_v37 = vsub.f32 %v479_v32, %v482_v35 }
 0x223   : > { %v488_v38 = vmul.f32 %v487_v36, %v483_v37 }
 0x225   : > { %v489_v39 = vmul.f32 %v488_v38, %v488_v38 }
 0x227   : > { %490 = vadd.xlane.f32.xlu0 %v489_v39 }
 0x2b4   : > { %v491_v40 = vpop.xlane.xlu0 %490 }
 0x2b5   : > { %v492_v41 = vmul.f32 0.015625, %v491_v40 }
 0x2b7   : > { %v493_v42 = vadd.f32 1e-05, %v492_v41 }
 0x2b9   : > { %779 = vrsqrt.f32 %v493_v42 }
 0x2c3   : > { %v780_v46 = vpop.eup %779 }
 0x2c4   : > { %v495_v47 = vmul.f32 %v780_v46, %v488_v38 }
 0x2c6   : > { %v500_v49 = vmul.f32 %v499_v45, %v495_v47 }
 0x2c8   : > { %v505_v50 = vadd.f32 %v504_v48, %v500_v49 }
 0x2ca   : > { %v658_v51 = vmul.f32 -1.442695, %v505_v50 }
 0x2cc   : > { %781 = vpow2.f32 %v658_v51 }
 0x2d6   : > { %v782_v52 = vpop.eup %781 }
 0x2d7   : > { %v509_v53 = vadd.f32 1.0, %v782_v52 }
 0x2d9   : > { %783 = vrcp.f32 %v509_v53 }
 0x2e3   : > { %v784_v54 = vpop.eup %783 }
 0x2e4   : > { %v512_v55 = vmul.f32 %v784_v54, %v505_v50 }
 0x2e6   : > { %513 = vst [vmem:[%s305_s30] sm:$0xff] %v512_v55 }
 0x2e7   : > { %914 = shalt.err (!%p911_p7)
}
 0x2e8   : > { %s915_s17 = scalar_lea.hbm %s1256_s6, 128  ;;  %s919_s26 = scalar_lea.hbm %s1305_s5, 256 }
 0x2e9   : > { %p916_p1 = scmp.ne.s32.totalorder %s1256_s6, %s915_s17  ;;  %p920_p0 = scmp.lt.u32.totalorder %s1256_s6, %s1305_s5 }
 0x2ea   : > { %p921_p9 = scmp.lt.u32.totalorder %s919_s26, %s915_s17  ;;  %p923_p2 = scmp.lt.u32.totalorder %s915_s17, %s1256_s6 }
 0x2eb   : > { %p917_p8 = pnand %p916_p1, %p1327_p13 }
 0x2ec   : > { %p922_p12 = por %p921_p9, %p920_p0 }
 0x2ed   : > { %p918_p11 = pneg %p917_p8 }
 0x2ee   : > { %p924_p6 = por %p923_p2, %p922_p12 }
 0x2f0   : > { %p925_p10 = pnand %p924_p6, %p918_p11 }
 0x2f2   : > { %928 = shalt.err (!%p925_p10)
}
 0x2f3   : > { %710 = dma.vmem_to_hbm [thread:$0]  (%p1327_p13), %s1258_s15, 128, %s1256_s6, %s515_s8  }
 0x2f4 PF: > { %s540_s24 = sand.u32 1, %s967_s18   ;;  %p1328_p4 = scmp.ne.s32.totalorder %s1313_s25, 0 }
 0x2f5   : > { %p1329_p5 = scmp.ge.s32.totalorder %s979_s21, 2  ;;  %s541_s16 = scalar_lea.sflag [#allocation4], %s540_s24 }
 0x2f7   : > { %p727_p3 = pnand %p1329_p5, %p1328_p4 }
 0x2f9   : > { %962 = dma.done.wait (!%p727_p3), %s541_s16, 128  }
 0x2fa   : > { %964 = vsyncadd (!%p727_p3), %s541_s16, 4294967168  ;;  %p22_p7 = scmp.ge.s32.totalorder %s1131_s14, 4   ;;  %s1330_s18 = smov %s971_s19 }
 0x2fb   : > { %s1331_s19 = smov %s975_s20  ;;  %s1332_s20 = smov %s1147_s27 }
 0x2fc   : > { %s1333_s21 = smov %s1131_s14  ;;  %24 = sbr.rel (!%p22_p7) target bundleno = 11 (0xb), region = 106 }
 0x303   :  { %546 = vsyncpa [#allocation3], 1 }
 0x304   :  { %548 = vsyncpa [#allocation3 + $0x1], 1 }
 0x305   :  { %549 = vsyncpa [#allocation6], 1 }
 0x306   :  { %551 = vsyncpa [#allocation6 + $0x1], 1 }
 0x307   :  { %552 = vsyncpa [#allocation9], 1 }
 0x308   :  { %553 = vsyncpa [#allocation4], 1 }
 0x309   :  { %555 = vsyncpa [#allocation4 + $0x1], 1 }

</bundles_post_ra>
